<compile_context>
chip_gen: v7x
topology: tpu7x:2x2x1
jax: 0.10.0
libtpu: 0.0.40
codegen_flags: <defaults>
</compile_context>

<pallas_src>
import functools

import jax
import jax.numpy as jnp
from jax import lax
from jax.experimental import pallas as pl
from jax.experimental.pallas import tpu as pltpu

_LANES = 128
_RAGGED_BLOCK_COLS = 64 * 1024   # columns per block on the (1, n) ragged path


def _cdiv(a, b):
    return (a + b - 1) // b


@functools.lru_cache(maxsize=None)
def _max_block_rows():
    """Per-generation streaming block height (rows of 128 lanes)."""
    try:
        kind = jax.devices()[0].device_kind.lower()
    except Exception:
        kind = ""
    if "v6" in kind or "v7" in kind:
        return 4096   # 2 MiB f32 per stream per pipeline buffer
    return 2048       # v5e (16 MiB default scoped VMEM) and unknown chips


def _dice_partial_kernel(*refs, weighted, blocked_axis, tail):
    """Accumulate [sum(x*y[*w]), sum(x+y)] into a VMEM-resident f32 block.

    Grid is 1-D over blocks of the `blocked_axis`.  `tail` (> 0 only when the
    last block is partial) is the number of valid positions along that axis in
    the final block; only that block executes the masking code.
    """
    if weighted:
        x_ref, y_ref, w_ref, out_ref = refs
    else:
        x_ref, y_ref, out_ref = refs
        w_ref = None

    i = pl.program_id(0)

    @pl.when(i == 0)
    def _():
        out_ref[...] = jnp.zeros_like(out_ref)

    def accumulate(mask_tail):
        x = x_ref[...].astype(jnp.float32)
        y = y_ref[...].astype(jnp.float32)
        inter = x * y
        if weighted:
            inter = inter * w_ref[...].astype(jnp.float32)
        tot = x + y
        if mask_tail:
            idx = lax.broadcasted_iota(jnp.int32, x.shape, blocked_axis)
            valid = idx < tail
            inter = jnp.where(valid, inter, 0.0)
            tot = jnp.where(valid, tot, 0.0)
        # Pure-VPU (plus one small cross-lane/sublane reduce) fold along the
        # blocked axis; the other axis stays resident in the accumulator.
        out_ref[0, :, :] += jnp.sum(inter, axis=blocked_axis, keepdims=True)
        out_ref[1, :, :] += jnp.sum(tot, axis=blocked_axis, keepdims=True)

    if tail == 0:
        accumulate(False)
    else:
        last = pl.num_programs(0) - 1

        @pl.when(i != last)
        def _():
            accumulate(False)

        @pl.when(i == last)
        def _():
            accumulate(True)


def _partial_sums(x2, y2, w2, *, blocked_axis, block):
    """Run the streaming kernel over 2-D views -> (intersection, total)."""
    dim = x2.shape[blocked_axis]
    block = min(block, dim)
    nblocks = _cdiv(dim, block)
    tail = dim % block            # > 0 only if the last block is partial
    weighted = w2 is not None
    operands = [x2, y2] + ([w2] if weighted else [])

    if blocked_axis == 0:
        block_shape = (block, _LANES)
        index_map = lambda i: (i, 0)
        out_shape = (2, 1, _LANES)
    else:
        block_shape = (1, block)
        index_map = lambda i: (0, i)
        out_shape = (2, 1, 1)

    in_spec = pl.BlockSpec(block_shape, index_map)
    out_spec = pl.BlockSpec(out_shape, lambda i: (0, 0, 0))

    n_elems = x2.size
    bytes_in = sum(op.size * jnp.dtype(op.dtype).itemsize for op in operands)
    out_bytes = 2 * out_shape[1] * out_shape[2] * 4
    cost = pl.CostEstimate(
        flops=(3 if weighted else 2) * n_elems + 2 * n_elems,
        transcendentals=0,
        bytes_accessed=bytes_in + out_bytes,
    )

    kernel = functools.partial(
        _dice_partial_kernel,
        weighted=weighted,
        blocked_axis=blocked_axis,
        tail=tail,
    )

    partials = pl.pallas_call(
        kernel,
        out_shape=jax.ShapeDtypeStruct(out_shape, jnp.float32),
        grid_spec=pltpu.PrefetchScalarGridSpec(
            num_scalar_prefetch=0,
            grid=(nblocks,),
            in_specs=[in_spec] * len(operands),
            out_specs=out_spec,
        ),
        compiler_params=pltpu.CompilerParams(
            dimension_semantics=("arbitrary",),
        ),
        cost_estimate=cost,
    )(*operands)

    intersection = jnp.sum(partials[0], dtype=jnp.float32)
    total = jnp.sum(partials[1], dtype=jnp.float32)
    return intersection, total


def dice_loss(inputs, targets, weights=None, smooth=1.0):
    """Pallas TPU implementation of DiceLoss.forward."""
    x = inputs.reshape(-1)
    y = targets.reshape(-1)
    w = None if weights is None else weights.reshape(-1)
    n = x.shape[0]

    if n == 0:
        # All sums are zero -> dice = smooth/smooth = 1 -> loss = 0.
        return jnp.float32(0.0)

    if n % _LANES == 0:
        # Common case: free reshape to (rows, 128); no copies, no JAX tail.
        rows = n // _LANES
        intersection, total = _partial_sums(
            x.reshape(rows, _LANES),
            y.reshape(rows, _LANES),
            None if w is None else w.reshape(rows, _LANES),
            blocked_axis=0,
            block=_max_block_rows(),
        )
    else:
        # Ragged size: free reshape to a (1, n) row view; the final partial
        # block is masked inside the kernel (still zero host-side copies).
        intersection, total = _partial_sums(
            x.reshape(1, n),
            y.reshape(1, n),
            None if w is None else w.reshape(1, n),
            blocked_axis=1,
            block=_RAGGED_BLOCK_COLS,
        )

    smooth = jnp.float32(smooth)
    dice = (2.0 * intersection + smooth) / (total + smooth)
    return 1.0 - dice


def _dice_loss_ref(inputs, targets, weights=None, smooth=1.0):
    """Pure-JAX reference matching the PyTorch module."""
    x = inputs.reshape(-1).astype(jnp.float32)
    y = targets.reshape(-1).astype(jnp.float32)
    if weights is not None:
        w = weights.reshape(-1).astype(jnp.float32)
        intersection = jnp.sum(x * y * w)
    else:
        intersection = jnp.sum(x * y)
    dice = (2.0 * intersection + smooth) / (jnp.sum(x) + jnp.sum(y) + smooth)
    return 1.0 - dice


if __name__ == "__main__":
    key = jax.random.PRNGKey(0)
    k1, k2, k3, k4, k5, k6, k7, k8 = jax.random.split(key, 8)

    # NCHW-shaped example (typical segmentation probability / mask pair).
    shape = (2, 4, 16, 16)
    inputs = jax.nn.sigmoid(jax.random.normal(k1, shape, dtype=jnp.float32))
    targets = (jax.random.uniform(k2, shape) > 0.5).astype(jnp.float32)
    weights = jax.random.uniform(k3, shape, dtype=jnp.float32)

    # Unweighted path (2-stream kernel, 128-aligned single block).
    loss = jax.block_until_ready(dice_loss(inputs, targets))
    ref = _dice_loss_ref(inputs, targets)
    assert jnp.allclose(loss, ref, rtol=1e-5, atol=1e-5), (loss, ref)

    # Weighted path (3-stream kernel).
    loss_w = jax.block_until_ready(dice_loss(inputs, targets, weights=weights))
    ref_w = _dice_loss_ref(inputs, targets, weights=weights)
    assert jnp.allclose(loss_w, ref_w, rtol=1e-5, atol=1e-5), (loss_w, ref_w)

    # Ragged shape: exercises the zero-copy (1, n) row-view kernel path.
    shape_r = (3, 5, 7, 11)  # 1155 elements, not a multiple of 128
    xr = jax.nn.sigmoid(jax.random.normal(k4, shape_r, dtype=jnp.float32))
    yr = (jax.random.uniform(k5, shape_r) > 0.5).astype(jnp.float32)
    loss_r = jax.block_until_ready(dice_loss(xr, yr))
    ref_r = _dice_loss_ref(xr, yr)
    assert jnp.allclose(loss_r, ref_r, rtol=1e-5, atol=1e-5), (loss_r, ref_r)

    # Multi-block + masked-tail coverage with tiny blocks (driver-level tests).
    # 1) Row-blocked path, weighted, 150 rows with block=16 -> 10 blocks, tail=6.
    xm = jax.random.uniform(k6, (150, _LANES), dtype=jnp.float32)
    ym = jax.random.uniform(k7, (150, _LANES), dtype=jnp.float32)
    wm = jax.random.uniform(k8, (150, _LANES), dtype=jnp.float32)
    im, tm = _partial_sums(xm, ym, wm, blocked_axis=0, block=16)
    jax.block_until_ready(im)
    assert jnp.allclose(im, jnp.sum(xm * ym * wm), rtol=1e-4), im
    assert jnp.allclose(tm, jnp.sum(xm) + jnp.sum(ym), rtol=1e-4), tm
    # 2) Column-blocked (ragged) path, 1155 cols with block=512 -> 3 blocks, tail=131.
    xr1 = xr.reshape(1, -1)
    yr1 = yr.reshape(1, -1)
    ir, tr = _partial_sums(xr1, yr1, None, blocked_axis=1, block=512)
    jax.block_until_ready(ir)
    assert jnp.allclose(ir, jnp.sum(xr1 * yr1), rtol=1e-4), ir
    assert jnp.allclose(tr, jnp.sum(xr1) + jnp.sum(yr1), rtol=1e-4), tr

    print("KERNEL_OK")
</pallas_src>

<mosaic_0001>
module attributes {stable_mosaic.version = 11 : i64} {
  func.func @_dice_partial_kernel(%arg0: i32, %arg1: memref<16x128xf32, #tpu.memory_space<vmem>>, %arg2: memref<16x128xf32, #tpu.memory_space<vmem>>, %arg3: memref<2x1x128xf32, #tpu.memory_space<vmem>>) attributes {dimension_semantics = [#tpu.dimension_semantics<arbitrary>], iteration_bounds = array<i64: 1>, scalar_prefetch = 0 : i64, scratch_operands = 0 : i64, tpu.core_type = #tpu.core_type<tc>, window_params = [{transform_indices = @transform_0, window_bounds = array<i64: 16, 128>}, {transform_indices = @transform_1, window_bounds = array<i64: 16, 128>}, {pipeline_mode = #tpu.pipeline_mode<synchronous>, transform_indices = @transform_2, window_bounds = array<i64: 2, 1, 128>}]} {
    %c0_i32 = arith.constant 0 : i32
    %0 = arith.cmpi eq, %arg0, %c0_i32 : i32
    %1 = arith.extui %0 : i1 to i32
    %c0_i32_0 = arith.constant 0 : i32
    %2 = arith.cmpi ne, %1, %c0_i32_0 : i32
    scf.if %2 {
      %cst_16 = arith.constant 0.000000e+00 : f32
      %23 = vector.broadcast %cst_16 : f32 to vector<2x1x128xf32>
      %c0_17 = arith.constant 0 : index
      %c0_18 = arith.constant 0 : index
      %c0_19 = arith.constant 0 : index
      %24 = vector.load %arg3[%c0_17, %c0_18, %c0_19] : memref<2x1x128xf32, #tpu.memory_space<vmem>>, vector<2x1x128xf32>
      tpu.vector_store %arg3[%c0_17, %c0_18, %c0_19], %23 {strides = array<i32>} : memref<2x1x128xf32, #tpu.memory_space<vmem>>, vector<2x1x128xf32>,
    } else {
    }
    %c0 = arith.constant 0 : index
    %c0_1 = arith.constant 0 : index
    %3 = vector.load %arg1[%c0, %c0_1] : memref<16x128xf32, #tpu.memory_space<vmem>>, vector<16x128xf32>
    %c0_2 = arith.constant 0 : index
    %c0_3 = arith.constant 0 : index
    %4 = vector.load %arg2[%c0_2, %c0_3] : memref<16x128xf32, #tpu.memory_space<vmem>>, vector<16x128xf32>
    %5 = arith.mulf %3, %4 : vector<16x128xf32>
    %6 = arith.addf %3, %4 : vector<16x128xf32>
    %c0_4 = arith.constant 0 : index
    %c0_5 = arith.constant 0 : index
    %c0_6 = arith.constant 0 : index
    %7 = vector.load %arg3[%c0_4, %c0_5, %c0_6] : memref<2x1x128xf32, #tpu.memory_space<vmem>>, vector<1x1x128xf32>
    %8 = vector.shape_cast %7 : vector<1x1x128xf32> to vector<1x128xf32>
    %cst = arith.constant dense<0.000000e+00> : vector<128xf32>
    %9 = vector.multi_reduction <add>, %5, %cst [0] : vector<16x128xf32> to vector<128xf32>
    %10 = vector.shape_cast %9 : vector<128xf32> to vector<1x128xf32>
    %11 = arith.addf %8, %10 : vector<1x128xf32>
    %c0_7 = arith.constant 0 : index
    %c0_8 = arith.constant 0 : index
    %c0_9 = arith.constant 0 : index
    %12 = vector.load %arg3[%c0_7, %c0_8, %c0_9] : memref<2x1x128xf32, #tpu.memory_space<vmem>>, vector<1x1x128xf32>
    %13 = vector.shape_cast %12 : vector<1x1x128xf32> to vector<1x128xf32>
    %14 = vector.shape_cast %11 : vector<1x128xf32> to vector<1x1x128xf32>
    tpu.vector_store %arg3[%c0_7, %c0_8, %c0_9], %14 {strides = array<i32>} : memref<2x1x128xf32, #tpu.memory_space<vmem>>, vector<1x1x128xf32>,
    %c1 = arith.constant 1 : index
    %c0_10 = arith.constant 0 : index
    %c0_11 = arith.constant 0 : index
    %15 = vector.load %arg3[%c1, %c0_10, %c0_11] : memref<2x1x128xf32, #tpu.memory_space<vmem>>, vector<1x1x128xf32>
    %16 = vector.shape_cast %15 : vector<1x1x128xf32> to vector<1x128xf32>
    %cst_12 = arith.constant dense<0.000000e+00> : vector<128xf32>
    %17 = vector.multi_reduction <add>, %6, %cst_12 [0] : vector<16x128xf32> to vector<128xf32>
    %18 = vector.shape_cast %17 : vector<128xf32> to vector<1x128xf32>
    %19 = arith.addf %16, %18 : vector<1x128xf32>
    %c1_13 = arith.constant 1 : index
    %c0_14 = arith.constant 0 : index
    %c0_15 = arith.constant 0 : index
    %20 = vector.load %arg3[%c1_13, %c0_14, %c0_15] : memref<2x1x128xf32, #tpu.memory_space<vmem>>, vector<1x1x128xf32>
    %21 = vector.shape_cast %20 : vector<1x1x128xf32> to vector<1x128xf32>
    %22 = vector.shape_cast %19 : vector<1x128xf32> to vector<1x1x128xf32>
    tpu.vector_store %arg3[%c1_13, %c0_14, %c0_15], %22 {strides = array<i32>} : memref<2x1x128xf32, #tpu.memory_space<vmem>>, vector<1x1x128xf32>,
    return
  }
  func.func @transform_0(%arg0: i32) -> (i32, i32) {
    %c0_i32 = arith.constant 0 : i32
    %c0_i32_0 = arith.constant 0 : i32
    return %arg0, %c0_i32 : i32, i32
  }
  func.func @transform_1(%arg0: i32) -> (i32, i32) {
    %c0_i32 = arith.constant 0 : i32
    %c0_i32_0 = arith.constant 0 : i32
    return %arg0, %c0_i32 : i32, i32
  }
  func.func @transform_2(%arg0: i32) -> (i32, i32, i32) {
    %c0_i32 = arith.constant 0 : i32
    %c0_i32_0 = arith.constant 0 : i32
    %c0_i32_1 = arith.constant 0 : i32
    %c0_i32_2 = arith.constant 0 : i32
    return %c0_i32, %c0_i32_0, %c0_i32_1 : i32, i32, i32
  }
}

</mosaic_0001>

<bundles_post_ra>
// kernel: tpu_custom_call.1
= control target key start
LH: loop header
LB: loop body
LE: loop exit
PB: predicated region body
PF: predicated region fallthrough
CT: control target
= control target key end

     0   :  { %7 = vsyncpa [#allocation3], 0  ;;  %s232_s0 = inlined_call_operand.hbm [shape: f32[16,128], index: 0, kind: input, shape index: {}]   ;;  %s233_s1 = inlined_call_operand.hbm [shape: f32[16,128], index: 1, kind: input, shape index: {}]   ;;  %s234_s2 = inlined_call_operand.hbm [shape: f32[2,1,128], index: 2, kind: output, shape index: {}]  }
   0x1   :  { %8 = vsyncpa [#allocation6], 0 }
   0x2   :  { %9 = vsyncpa [#allocation4], 0  ;;  %s173_s9 = smov [#allocation2]   ;;  %s101_s13 = scalar_lea.hbm %s232_s0, 256 }
   0x3   :  { %s15_s10 = sshll.u32 %s173_s9, 4  ;;  %p102_p0 = scmp.ne.s32.totalorder %s232_s0, %s101_s13  ;;  %s16_s10 = int_to_ptr.vmem [resolvable:$true] %s15_s10 }
   0x4   :  { %p105_p1 = scmp.lt.u32.totalorder %s101_s13, %s232_s0 }
   0x6   :  { %p107_p2 = pnand %p105_p1, %p102_p0 }
   0x8   :  { %110 = shalt.err (!%p107_p2)
}
   0x9   :  { %s111_s18 = scalar_lea.vmem %s16_s10, 256  ;;  %p116_p4 = scmp.lt.s32.totalorder %s16_s10, %s16_s10 }
   0xa   :  { %p112_p3 = scmp.ne.s32.totalorder %s16_s10, %s111_s18  ;;  %p117_p5 = scmp.lt.s32.totalorder %s111_s18, %s111_s18 }
   0xc   :  { %p118_p6 = por %p117_p5, %p116_p4 }
   0xe   :  { %p119_p7 = pnand %p118_p6, %p112_p3 }
  0x10   :  { %122 = shalt.err (!%p119_p7)
}
  0x11   :  { %s174_s19 = smov 128   ;;  %s175_s20 = smov 8  }
  0x12   :  { %21 = dma.hbm_to_vmem [thread:$0]  %s232_s0, 256, %s16_s10, [#allocation3], %s174_s19, %s174_s19, %s175_s20  }
  0x13   :  { %s176_s23 = smov [#allocation5]   ;;  %s123_s27 = scalar_lea.hbm %s233_s1, 256 }
  0x14   :  { %s27_s24 = sshll.u32 %s176_s23, 4  ;;  %p124_p8 = scmp.ne.s32.totalorder %s233_s1, %s123_s27  ;;  %s28_s24 = int_to_ptr.vmem [resolvable:$true] %s27_s24 }
  0x15   :  { %p127_p9 = scmp.lt.u32.totalorder %s123_s27, %s233_s1 }
  0x17   :  { %p129_p10 = pnand %p127_p9, %p124_p8 }
  0x19   :  { %132 = shalt.err (!%p129_p10)
}
  0x1a   :  { %s133_s4 = scalar_lea.vmem %s28_s24, 256  ;;  %p138_p12 = scmp.lt.s32.totalorder %s28_s24, %s28_s24 }
  0x1b   :  { %p134_p11 = scmp.ne.s32.totalorder %s28_s24, %s133_s4  ;;  %p139_p13 = scmp.lt.s32.totalorder %s133_s4, %s133_s4 }
  0x1d   :  { %p140_p0 = por %p139_p13, %p138_p12 }
  0x1f   :  { %p141_p1 = pnand %p140_p0, %p134_p11 }
  0x21   :  { %144 = shalt.err (!%p141_p1)
}
  0x22   :  { %33 = dma.hbm_to_vmem [thread:$0]  %s233_s1, 256, %s28_s24, [#allocation6], %s174_s19, %s174_s19, %s175_s20  }
  0x23   :  { %167 = dma.done.wait [#allocation3], 256  }
  0x24   :  { %168 = vsyncadd [#allocation3], 4294967040 }
  0x25   :  { %169 = dma.done.wait [#allocation6], 256  }
  0x26   :  { %170 = vsyncadd [#allocation6], 4294967040  ;;  %v177_v0 = vmov 0.0   ;;  %v46_v1 = vld [vmem:[#allocation2] sm:$0xff]  ;;  %v47_v2 = vld [vmem:[#allocation2 + $0x8] sm:$0xff]  ;;  %s178_s1 = smov [#allocation7]  }
  0x27   :  { %44 = vst [vmem:[#allocation7] sm:$0x1] %v177_v0  ;;  %45 = vst [vmem:[#allocation7 + $0x1] sm:$0x1] %v177_v0  ;;  %v48_v3 = vld [vmem:[#allocation5] sm:$0xff]  ;;  %v49_v4 = vld [vmem:[#allocation5 + $0x8] sm:$0xff] }
  0x28   :  { %v50_v5 = vmul.f32 %v48_v3, %v46_v1  ;;  %v52_v6 = vadd.f32 %v48_v3, %v46_v1  ;;  %v51_v7 = vmul.f32 %v49_v4, %v47_v2  ;;  %v53_v8 = vadd.f32 %v49_v4, %v47_v2  ;;  %s80_s6 = sshll.u32 %s178_s1, 4  ;;  %s81_s6 = int_to_ptr.vmem [resolvable:$true] %s80_s6 }
  0x29   :  { %s145_s7 = scalar_lea.vmem %s81_s6, 32  ;;  %p150_p3 = scmp.lt.s32.totalorder %s81_s6, %s81_s6 }
  0x2a   :  { %v55_v9 = vadd.f32 %v51_v7, %v50_v5  ;;  %v66_v10 = vadd.f32 %v53_v8, %v52_v6  ;;  %p146_p2 = scmp.ne.s32.totalorder %s81_s6, %s145_s7  ;;  %p151_p4 = scmp.lt.s32.totalorder %s145_s7, %s145_s7 }
  0x2c   :  { %v56_v11 = vrot.slane %v55_v9, 4  ;;  %v67_v12 = vrot.slane %v66_v10, 4  ;;  %p152_p5 = por %p151_p4, %p150_p3 }
  0x2e   :  { %v57_v13 = vadd.f32 %v56_v11, %v55_v9  ;;  %v68_v14 = vadd.f32 %v67_v12, %v66_v10  ;;  %v54_v21 = vld [vmem:[#allocation7] sm:$0x1]  ;;  %v65_v22 = vld [vmem:[#allocation7 + $0x1] sm:$0x1]  ;;  %p153_p6 = pnand %p152_p5, %p146_p2 }
  0x30   :  { %v58_v15 = vrot.slane %v57_v13, 2  ;;  %v69_v16 = vrot.slane %v68_v14, 2 }
  0x32   :  { %v59_v17 = vadd.f32 %v58_v15, %v57_v13  ;;  %v70_v18 = vadd.f32 %v69_v16, %v68_v14 }
  0x34   :  { %v60_v19 = vrot.slane %v59_v17, 1  ;;  %v71_v20 = vrot.slane %v70_v18, 1 }
  0x36   :  { %v61_v23 = vadd.f32 %v60_v19, %v59_v17  ;;  %v72_v24 = vadd.f32 %v71_v20, %v70_v18 }
  0x38   :  { %v62_v25 = vadd.f32 %v61_v23, %v54_v21  ;;  %v73_v26 = vadd.f32 %v72_v24, %v65_v22 }
  0x3a   :  { %63 = vst [vmem:[#allocation7] sm:$0x1] %v62_v25  ;;  %74 = vst [vmem:[#allocation7 + $0x1] sm:$0x1] %v73_v26 }
  0x3b   :  { %156 = shalt.err (!%p153_p6)
}
  0x3c   :  { %s157_s10 = scalar_lea.hbm %s234_s2, 32 }
  0x3d   :  { %p158_p7 = scmp.ne.s32.totalorder %s234_s2, %s157_s10  ;;  %p161_p8 = scmp.lt.u32.totalorder %s157_s10, %s234_s2 }
  0x3f   :  { %p163_p9 = pnand %p161_p8, %p158_p7 }
  0x41   :  { %166 = shalt.err (!%p163_p9)
}
  0x42   :  { %s179_s15 = smov 16   ;;  %s180_s16 = smov 1  }
  0x43   :  { %86 = dma.vmem_to_hbm [thread:$0]  %s81_s6, 32, %s234_s2, [#allocation4], %s179_s15, %s179_s15, %s180_s16  }
  0x44   :  { %171 = dma.done.wait [#allocation4], 32  }
  0x45   :  { %172 = vsyncadd [#allocation4], 4294967264 }
  0x46   :  { %90 = vsyncpa [#allocation3], 1 }
  0x47   :  { %91 = vsyncpa [#allocation6], 1 }
  0x48   :  { %92 = vsyncpa [#allocation4], 1 }

</bundles_post_ra>
